<compile_context>
chip_gen: v7x
topology: tpu7x:2x2x1
jax: 0.10.0
libtpu: 0.0.40
codegen_flags: <defaults>
</compile_context>

<pallas_src>
import functools

import numpy as np
import jax
import jax.numpy as jnp
from jax import lax
from jax.experimental import pallas as pl
from jax.experimental.pallas import tpu as pltpu


# ----------------------------------------------------------------------------
# Positional table (identical math to the PyTorch reference)
# ----------------------------------------------------------------------------
def pos_table(n, dim):
    def get_angle(x, h):
        return x / np.power(10000, 2 * (h // 2) / dim)

    tab = np.array(
        [[get_angle(i, j) for j in range(dim)] for i in range(n)]
    ).astype(np.float64)
    tab[:, 0::2] = np.sin(tab[:, 0::2])
    tab[:, 1::2] = np.cos(tab[:, 1::2])
    return tab.astype(np.float32)


# ----------------------------------------------------------------------------
# Fused Pallas kernel: one chunk of TILE_T recurrent steps per grid iteration
# ----------------------------------------------------------------------------
def _attention_neuron_chunk_kernel(
    # streamed per-chunk inputs (block index follows grid axis c)
    gate_x_ref,   # (TILE_T, obs, 4P)  precomputed x_aug @ W_ih^T + b  ([i,f,o,g] cols)
    x_obs_ref,    # (TILE_T, obs)      raw observation rows
    # constant inputs (DMA'd once; block index fixed at (0, 0))
    h0_ref,       # (obs, P)           initial LSTM hidden
    c0_ref,       # (obs, P)           initial LSTM cell
    w_hh_t_ref,   # (P, 4P)            LSTM hidden weights, reordered + pre-transposed
    wk_t_ref,     # (P, msg)           key projection, pre-transposed
    bk_ref,       # (1, msg)
    q_t_ref,      # (msg, H)           precomputed query projection, transposed
    # outputs
    out_ref,      # (TILE_T, H)        tanh(w @ x) per step, lane-dense rows
    h_out_ref,    # (obs, P)           final hidden (written on last chunk)
    c_out_ref,    # (obs, P)           final cell   (written on last chunk)
    # scratch (persistent across grid steps => guaranteed chunk-to-chunk carry)
    h_scr,        # (obs, P)
    c_scr,        # (obs, P)
    *, pos_em_dim, tile_t, t_real, inv_sqrt_msg,
):
    P = pos_em_dim
    chunk = pl.program_id(0)
    n_chunks = pl.num_programs(0)

    # ---- initialize recurrent state in VMEM scratch on the first chunk ----
    @pl.when(chunk == 0)
    def _():
        h_scr[...] = h0_ref[...]
        c_scr[...] = c0_ref[...]

    # Number of real (unpadded) timesteps in this chunk; padded tail rows of
    # the last chunk are never read nor used to advance the state.
    steps = jnp.minimum(tile_t, t_real - chunk * tile_t)

    # Hoist constant weight reads out of the recurrent loop.
    w_hh_t = w_hh_t_ref[...]
    wk_t = wk_t_ref[...]
    bk = bk_ref[...]
    q_t = q_t_ref[...]

    def body(t, carry):
        h, c = carry
        # ---- LSTMCell: only the h-dependent matmul is on the serial chain ----
        gates = gate_x_ref[t] + jnp.dot(
            h, w_hh_t, preferred_element_type=jnp.float32)      # (obs, 4P) [i,f,o,g]
        sig = jax.nn.sigmoid(gates[:, :3 * P])                   # i, f, o
        g_g = jnp.tanh(gates[:, 3 * P:])                         # g
        i_g = sig[:, :P]
        f_g = sig[:, P:2 * P]
        o_g = sig[:, 2 * P:]
        c_new = f_g * c + i_g * g_g
        h_new = o_g * jnp.tanh(c_new)

        # ---- attention: k = h Wk^T + bk ; wt = tanh(k q^T / sqrt(msg)) ----
        k = jnp.dot(h_new, wk_t, preferred_element_type=jnp.float32) + bk   # (obs, msg)
        wt = jnp.tanh(jnp.dot(k, q_t, preferred_element_type=jnp.float32)
                      * inv_sqrt_msg)                                        # (obs, H)

        # ---- readout: out = tanh(x_row @ wt), lane-dense (1, H) row ----
        x_row = x_obs_ref[pl.ds(t, 1), :]                                    # (1, obs)
        out_ref[pl.ds(t, 1), :] = jnp.tanh(
            jnp.dot(x_row, wt, preferred_element_type=jnp.float32))
        return h_new, c_new

    h_fin, c_fin = lax.fori_loop(0, steps, body, (h_scr[...], c_scr[...]))

    # Carry state to the next chunk; write back to HBM only once at the end.
    h_scr[...] = h_fin
    c_scr[...] = c_fin

    @pl.when(chunk == n_chunks - 1)
    def _():
        h_out_ref[...] = h_fin
        c_out_ref[...] = c_fin


# ----------------------------------------------------------------------------
# Module wrapper (parameters + recurrent state in plain JAX)
# ----------------------------------------------------------------------------
class AttentionNeuronLayerPallas:
    def __init__(self, act_dim, hidden_dim, msg_dim, pos_em_dim,
                 bias=True, scale=True, seed=0, tile_t=256):
        assert bias, "reference module is instantiated with bias=True"
        self.act_dim = act_dim
        self.hidden_dim = hidden_dim
        self.msg_dim = msg_dim
        self.pos_em_dim = pos_em_dim
        self.scale_div = float(msg_dim) if scale else 1.0
        self.tile_t = int(tile_t)
        self.hx = None

        self.pos_embedding = jnp.asarray(pos_table(hidden_dim, pos_em_dim))

        # Deterministic parameter init (PyTorch-style uniform(-k, k)).
        key = jax.random.PRNGKey(seed)
        ks = jax.random.split(key, 8)
        in_dim = 1 + act_dim
        lim = 1.0 / np.sqrt(pos_em_dim)

        def u(k, shape):
            return jax.random.uniform(k, shape, jnp.float32, -lim, lim)

        # Raw params (PyTorch layout: gate rows stacked [i, f, g, o]).
        self.w_ih = u(ks[0], (4 * pos_em_dim, in_dim))
        self.w_hh = u(ks[1], (4 * pos_em_dim, pos_em_dim))
        self.b_ih = u(ks[2], (4 * pos_em_dim,))
        self.b_hh = u(ks[3], (4 * pos_em_dim,))
        self.wq = u(ks[4], (msg_dim, pos_em_dim))
        self.bq = u(ks[5], (msg_dim,))
        self.wk = u(ks[6], (msg_dim, pos_em_dim))
        self.bk = u(ks[7], (msg_dim,))

        # Reorder gate row-blocks [i, f, g, o] -> [i, f, o, g] so the kernel can
        # apply sigmoid to the first 3P columns and tanh to the last P columns.
        def reorder_rows(w):
            i, f, g, o = jnp.split(w, 4, axis=0)
            return jnp.concatenate([i, f, o, g], axis=0)

        w_ih_r = reorder_rows(self.w_ih)                              # (4P, in)
        w_hh_r = reorder_rows(self.w_hh)                              # (4P, P)
        b_gate_r = reorder_rows(self.b_ih + self.b_hh)                # (4P,)

        # Pre-transposed / pre-fused kernel operands (computed once).
        self.w_ih_rt = jnp.asarray(w_ih_r.T)                          # (in, 4P)
        self.w_hh_rt = jnp.asarray(w_hh_r.T)                          # (P, 4P)
        self.b_gate_r = jnp.asarray(b_gate_r)                         # (4P,)
        self.wk_t = jnp.asarray(self.wk.T)                            # (P, msg)
        self.bk_row = self.bk.reshape(1, -1)                          # (1, msg)
        # Hoisted query projection (obs/hidden independent), stored transposed
        # so the in-kernel attention dot is a plain (obs,msg)x(msg,H) matmul.
        self.q_t = jnp.asarray((self.pos_embedding @ self.wq.T + self.bq).T)  # (msg, H)

    def reset(self):
        self.hx = None

    # -------------------------------------------------------------- kernel call
    def _fused_call(self, gate_x, x_obs, h0, c0, t_real, tile_t):
        t_pad, obs_dim, g4 = gate_x.shape
        P, H, M = self.pos_em_dim, self.hidden_dim, self.msg_dim
        num_chunks = t_pad // tile_t

        kernel = functools.partial(
            _attention_neuron_chunk_kernel,
            pos_em_dim=P,
            tile_t=tile_t,
            t_real=t_real,
            inv_sqrt_msg=float(1.0 / np.sqrt(self.scale_div)),
        )

        grid_spec = pltpu.PrefetchScalarGridSpec(
            num_scalar_prefetch=0,
            grid=(num_chunks,),
            in_specs=[
                # per-chunk streamed inputs
                pl.BlockSpec((tile_t, obs_dim, g4), lambda c: (c, 0, 0)),
                pl.BlockSpec((tile_t, obs_dim), lambda c: (c, 0)),
                # constant inputs (fetched once, stay resident in VMEM)
                pl.BlockSpec((obs_dim, P), lambda c: (0, 0)),
                pl.BlockSpec((obs_dim, P), lambda c: (0, 0)),
                pl.BlockSpec((P, 4 * P), lambda c: (0, 0)),
                pl.BlockSpec((P, M), lambda c: (0, 0)),
                pl.BlockSpec((1, M), lambda c: (0, 0)),
                pl.BlockSpec((M, H), lambda c: (0, 0)),
            ],
            out_specs=(
                pl.BlockSpec((tile_t, H), lambda c: (c, 0)),
                pl.BlockSpec((obs_dim, P), lambda c: (0, 0)),
                pl.BlockSpec((obs_dim, P), lambda c: (0, 0)),
            ),
            scratch_shapes=[
                pltpu.VMEM((obs_dim, P), jnp.float32),
                pltpu.VMEM((obs_dim, P), jnp.float32),
            ],
        )

        out_shapes = (
            jax.ShapeDtypeStruct((t_pad, H), jnp.float32),
            jax.ShapeDtypeStruct((obs_dim, P), jnp.float32),
            jax.ShapeDtypeStruct((obs_dim, P), jnp.float32),
        )

        return pl.pallas_call(
            kernel,
            grid_spec=grid_spec,
            out_shape=out_shapes,
            compiler_params=pltpu.CompilerParams(
                dimension_semantics=("arbitrary",),   # recurrent (time-chunk) axis
                vmem_limit_bytes=32 * 1024 * 1024,    # fine on v5e/v6e/v7x at these tiles
            ),
        )(gate_x, x_obs, h0, c0,
          self.w_hh_rt, self.wk_t, self.bk_row, self.q_t)

    # ------------------------------------------------------------- public API
    def forward_sequence(self, obs_seq, prev_act_seq):
        """Fused multi-step forward.  obs_seq: (T, obs_dim), prev_act_seq: (T, act_dim).
        Returns (T, hidden_dim, 1) and updates self.hx."""
        obs_seq = jnp.asarray(obs_seq, jnp.float32)
        prev_act_seq = jnp.asarray(prev_act_seq, jnp.float32)
        T, obs_dim = obs_seq.shape

        # Hoisted x-side gate pre-activation (one batched matmul, no (T,obs,1+act)
        # concat/broadcast ever materialized):
        #   gate_x[t, o, :] = obs[t, o] * W_row0 + act[t] @ W_rest + (b_ih + b_hh)
        gate_x = (obs_seq[:, :, None] * self.w_ih_rt[0][None, None, :]
                  + (prev_act_seq @ self.w_ih_rt[1:])[:, None, :]
                  + self.b_gate_r[None, None, :])                    # (T, obs, 4P)

        tile_t = min(self.tile_t, T)
        num_chunks = -(-T // tile_t)
        t_pad = num_chunks * tile_t
        if t_pad != T:
            gate_x = jnp.pad(gate_x, ((0, t_pad - T), (0, 0), (0, 0)))
            x_obs = jnp.pad(obs_seq, ((0, t_pad - T), (0, 0)))
        else:
            x_obs = obs_seq

        if self.hx is None:
            self.hx = (jnp.zeros((obs_dim, self.pos_em_dim), jnp.float32),
                       jnp.zeros((obs_dim, self.pos_em_dim), jnp.float32))

        out_pad, h_new, c_new = self._fused_call(
            gate_x, x_obs, self.hx[0], self.hx[1], T, tile_t)
        self.hx = (h_new, c_new)

        # Kernel emits lane-dense (T_pad, H); slice padding and restore the
        # PyTorch (T, H, 1) convention.
        return out_pad[:T, :, None]

    def forward(self, obs, prev_act):
        """Single-step forward matching the PyTorch module: returns (hidden_dim, 1)."""
        out_seq = self.forward_sequence(
            jnp.asarray(obs, jnp.float32)[None, :],
            jnp.asarray(prev_act, jnp.float32)[None, :])
        return out_seq[0]


# ----------------------------------------------------------------------------
# Pure-JAX step-by-step reference for verification (uses raw PyTorch-order params)
# ----------------------------------------------------------------------------
def reference_sequence(layer, obs_seq, act_seq, h0, c0):
    P = layer.pos_em_dim
    h, c = h0, c0
    outs = []
    for t in range(obs_seq.shape[0]):
        x = obs_seq[t][:, None]
        obs_dim = x.shape[0]
        x_aug = jnp.concatenate(
            [x, jnp.broadcast_to(act_seq[t][None, :], (obs_dim, layer.act_dim))],
            axis=-1)
        gates = x_aug @ layer.w_ih.T + layer.b_ih + h @ layer.w_hh.T + layer.b_hh
        i = jax.nn.sigmoid(gates[:, 0:P])
        f = jax.nn.sigmoid(gates[:, P:2 * P])
        g = jnp.tanh(gates[:, 2 * P:3 * P])
        o = jax.nn.sigmoid(gates[:, 3 * P:4 * P])
        c = f * c + i * g
        h = o * jnp.tanh(c)
        q = layer.pos_embedding @ layer.wq.T + layer.bq
        k = h @ layer.wk.T + layer.bk
        w = jnp.tanh((q @ k.T) / np.sqrt(layer.scale_div))
        outs.append(jnp.tanh(w @ x))
    return jnp.stack(outs), h, c


# ----------------------------------------------------------------------------
if __name__ == "__main__":
    act_dim, hidden_dim, msg_dim, pos_em_dim = 4, 32, 32, 8
    obs_dim = 16

    h0 = jnp.zeros((obs_dim, pos_em_dim), jnp.float32)
    c0 = jnp.zeros((obs_dim, pos_em_dim), jnp.float32)

    # --- Test 1: T=8 with default tile (single chunk) -------------------------
    T1 = 8
    layer = AttentionNeuronLayerPallas(
        act_dim=act_dim, hidden_dim=hidden_dim,
        msg_dim=msg_dim, pos_em_dim=pos_em_dim, seed=0)

    k_obs, k_act = jax.random.split(jax.random.PRNGKey(0))
    obs_seq = jax.random.normal(k_obs, (T1, obs_dim), jnp.float32)
    act_seq = jax.random.normal(k_act, (T1, act_dim), jnp.float32)

    ref_out, ref_h, ref_c = reference_sequence(layer, obs_seq, act_seq, h0, c0)
    out_seq = layer.forward_sequence(obs_seq, act_seq)
    jax.block_until_ready(out_seq)

    np.testing.assert_allclose(np.asarray(out_seq), np.asarray(ref_out),
                               rtol=1e-4, atol=1e-4)
    np.testing.assert_allclose(np.asarray(layer.hx[0]), np.asarray(ref_h),
                               rtol=1e-4, atol=1e-4)
    np.testing.assert_allclose(np.asarray(layer.hx[1]), np.asarray(ref_c),
                               rtol=1e-4, atol=1e-4)
    assert out_seq.shape == (T1, hidden_dim, 1)

    # --- Test 2: T=20 with tile_t=8 (3 chunks, ragged last chunk) -------------
    T2 = 20
    layer2 = AttentionNeuronLayerPallas(
        act_dim=act_dim, hidden_dim=hidden_dim,
        msg_dim=msg_dim, pos_em_dim=pos_em_dim, seed=0, tile_t=8)

    k_obs2, k_act2 = jax.random.split(jax.random.PRNGKey(1))
    obs_seq2 = jax.random.normal(k_obs2, (T2, obs_dim), jnp.float32)
    act_seq2 = jax.random.normal(k_act2, (T2, act_dim), jnp.float32)

    ref_out2, ref_h2, ref_c2 = reference_sequence(layer2, obs_seq2, act_seq2, h0, c0)
    out_seq2 = layer2.forward_sequence(obs_seq2, act_seq2)
    jax.block_until_ready(out_seq2)

    np.testing.assert_allclose(np.asarray(out_seq2), np.asarray(ref_out2),
                               rtol=1e-4, atol=1e-4)
    np.testing.assert_allclose(np.asarray(layer2.hx[0]), np.asarray(ref_h2),
                               rtol=1e-4, atol=1e-4)
    np.testing.assert_allclose(np.asarray(layer2.hx[1]), np.asarray(ref_c2),
                               rtol=1e-4, atol=1e-4)
    assert out_seq2.shape == (T2, hidden_dim, 1)

    # --- Test 3: single-step API (original module signature), continuing from
    #             the state left by the fused T=8 call above ------------------
    ref1, _, _ = reference_sequence(layer, obs_seq[:1], act_seq[:1],
                                    layer.hx[0], layer.hx[1])
    out1 = layer.forward(obs_seq[0], act_seq[0])
    jax.block_until_ready(out1)
    np.testing.assert_allclose(np.asarray(out1), np.asarray(ref1[0]),
                               rtol=1e-4, atol=1e-4)
    assert out1.shape == (hidden_dim, 1)

    print("KERNEL_OK")
</pallas_src>

<mosaic_0001>
module attributes {stable_mosaic.version = 11 : i64} {
  func.func @_attention_neuron_chunk_kernel(%arg0: i32, %arg1: memref<8x16x32xf32, #tpu.memory_space<vmem>>, %arg2: memref<8x16xf32, #tpu.memory_space<vmem>>, %arg3: memref<16x8xf32, #tpu.memory_space<vmem>>, %arg4: memref<16x8xf32, #tpu.memory_space<vmem>>, %arg5: memref<8x32xf32, #tpu.memory_space<vmem>>, %arg6: memref<8x32xf32, #tpu.memory_space<vmem>>, %arg7: memref<1x32xf32, #tpu.memory_space<vmem>>, %arg8: memref<32x32xf32, #tpu.memory_space<vmem>>, %arg9: memref<8x32xf32, #tpu.memory_space<vmem>>, %arg10: memref<16x8xf32, #tpu.memory_space<vmem>>, %arg11: memref<16x8xf32, #tpu.memory_space<vmem>>, %arg12: memref<16x8xf32, #tpu.memory_space<vmem>>, %arg13: memref<16x8xf32, #tpu.memory_space<vmem>>) attributes {dimension_semantics = [#tpu.dimension_semantics<arbitrary>], iteration_bounds = array<i64: 1>, scalar_prefetch = 0 : i64, scratch_operands = 2 : i64, tpu.core_type = #tpu.core_type<tc>, window_params = [{transform_indices = @transform_0, window_bounds = array<i64: 8, 16, 32>}, {transform_indices = @transform_1, window_bounds = array<i64: 8, 16>}, {pipeline_mode = #tpu.pipeline_mode<synchronous>, transform_indices = @transform_2, window_bounds = array<i64: 16, 8>}, {pipeline_mode = #tpu.pipeline_mode<synchronous>, transform_indices = @transform_3, window_bounds = array<i64: 16, 8>}, {pipeline_mode = #tpu.pipeline_mode<synchronous>, transform_indices = @transform_4, window_bounds = array<i64: 8, 32>}, {pipeline_mode = #tpu.pipeline_mode<synchronous>, transform_indices = @transform_5, window_bounds = array<i64: 8, 32>}, {pipeline_mode = #tpu.pipeline_mode<synchronous>, transform_indices = @transform_6, window_bounds = array<i64: 1, 32>}, {pipeline_mode = #tpu.pipeline_mode<synchronous>, transform_indices = @transform_7, window_bounds = array<i64: 32, 32>}, {transform_indices = @transform_8, window_bounds = array<i64: 8, 32>}, {pipeline_mode = #tpu.pipeline_mode<synchronous>, transform_indices = @transform_9, window_bounds = array<i64: 16, 8>}, {pipeline_mode = #tpu.pipeline_mode<synchronous>, transform_indices = @transform_10, window_bounds = array<i64: 16, 8>}]} {
    %c0_i32 = arith.constant 0 : i32
    %0 = arith.cmpi eq, %arg0, %c0_i32 : i32
    %1 = arith.extui %0 : i1 to i32
    %c0_i32_0 = arith.constant 0 : i32
    %2 = arith.cmpi ne, %1, %c0_i32_0 : i32
    scf.if %2 {
      %c0_21 = arith.constant 0 : index
      %c0_22 = arith.constant 0 : index
      %20 = vector.load %arg3[%c0_21, %c0_22] : memref<16x8xf32, #tpu.memory_space<vmem>>, vector<16x8xf32>
      %c0_23 = arith.constant 0 : index
      %c0_24 = arith.constant 0 : index
      %21 = vector.load %arg12[%c0_23, %c0_24] : memref<16x8xf32, #tpu.memory_space<vmem>>, vector<16x8xf32>
      tpu.vector_store %arg12[%c0_23, %c0_24], %20 {strides = array<i32>} : memref<16x8xf32, #tpu.memory_space<vmem>>, vector<16x8xf32>,
      %c0_25 = arith.constant 0 : index
      %c0_26 = arith.constant 0 : index
      %22 = vector.load %arg4[%c0_25, %c0_26] : memref<16x8xf32, #tpu.memory_space<vmem>>, vector<16x8xf32>
      %c0_27 = arith.constant 0 : index
      %c0_28 = arith.constant 0 : index
      %23 = vector.load %arg13[%c0_27, %c0_28] : memref<16x8xf32, #tpu.memory_space<vmem>>, vector<16x8xf32>
      tpu.vector_store %arg13[%c0_27, %c0_28], %22 {strides = array<i32>} : memref<16x8xf32, #tpu.memory_space<vmem>>, vector<16x8xf32>,
    } else {
    }
    %c8_i32 = arith.constant 8 : i32
    %3 = arith.muli %arg0, %c8_i32 : i32
    %c8_i32_1 = arith.constant 8 : i32
    %4 = arith.subi %c8_i32_1, %3 : i32
    %c8_i32_2 = arith.constant 8 : i32
    %5 = arith.minsi %c8_i32_2, %4 : i32
    %c0 = arith.constant 0 : index
    %c0_3 = arith.constant 0 : index
    %6 = vector.load %arg5[%c0, %c0_3] : memref<8x32xf32, #tpu.memory_space<vmem>>, vector<8x32xf32>
    %c0_4 = arith.constant 0 : index
    %c0_5 = arith.constant 0 : index
    %7 = vector.load %arg6[%c0_4, %c0_5] : memref<8x32xf32, #tpu.memory_space<vmem>>, vector<8x32xf32>
    %c0_6 = arith.constant 0 : index
    %c0_7 = arith.constant 0 : index
    %8 = vector.load %arg7[%c0_6, %c0_7] : memref<1x32xf32, #tpu.memory_space<vmem>>, vector<1x32xf32>
    %c0_8 = arith.constant 0 : index
    %c0_9 = arith.constant 0 : index
    %9 = vector.load %arg8[%c0_8, %c0_9] : memref<32x32xf32, #tpu.memory_space<vmem>>, vector<32x32xf32>
    %c0_10 = arith.constant 0 : index
    %c0_11 = arith.constant 0 : index
    %10 = vector.load %arg12[%c0_10, %c0_11] : memref<16x8xf32, #tpu.memory_space<vmem>>, vector<16x8xf32>
    %c0_12 = arith.constant 0 : index
    %c0_13 = arith.constant 0 : index
    %11 = vector.load %arg13[%c0_12, %c0_13] : memref<16x8xf32, #tpu.memory_space<vmem>>, vector<16x8xf32>
    %c0_i32_14 = arith.constant 0 : i32
    %12 = arith.subi %5, %c0_i32_14 : i32
    %13 = arith.addi %c0_i32_14, %12 : i32
    %c1_i32 = arith.constant 1 : i32
    %14:2 = scf.for %arg14 = %c0_i32_14 to %13 step %c1_i32 iter_args(%arg15 = %10, %arg16 = %11) -> (vector<16x8xf32>, vector<16x8xf32>)  : i32 {
      %20 = arith.index_cast %arg14 : i32 to index
      %c0_21 = arith.constant 0 : index
      %c0_22 = arith.constant 0 : index
      %21 = vector.load %arg1[%20, %c0_21, %c0_22] : memref<8x16x32xf32, #tpu.memory_space<vmem>>, vector<1x16x32xf32>
      %22 = vector.shape_cast %21 : vector<1x16x32xf32> to vector<16x32xf32>
      %cst = arith.constant dense<0.000000e+00> : vector<16x32xf32>
      %23 = tpu.matmul %arg15, %6, %cst {dimension_numbers = #tpu.dot_dimension_numbers<[1], [0], [0], [1], [0, 0, 1, 1], [], []>} : vector<16x8xf32>, vector<8x32xf32>, vector<16x32xf32> -> vector<16x32xf32>
      %24 = arith.addf %22, %23 : vector<16x32xf32>
      %25 = vector.extract_strided_slice %24 {offsets = [0, 0], sizes = [16, 24], strides = [1, 1]} : vector<16x32xf32> to vector<16x24xf32>
      %26 = arith.negf %25 : vector<16x24xf32>
      %27 = math.exp %26 : vector<16x24xf32>
      %cst_23 = arith.constant 1.000000e+00 : f32
      %28 = vector.broadcast %cst_23 : f32 to vector<16x24xf32>
      %29 = arith.addf %28, %27 : vector<16x24xf32>
      %30 = arith.divf %28, %29 : vector<16x24xf32>
      %31 = vector.extract_strided_slice %24 {offsets = [0, 24], sizes = [16, 8], strides = [1, 1]} : vector<16x32xf32> to vector<16x8xf32>
      %32 = math.tanh %31 : vector<16x8xf32>
      %33 = vector.extract_strided_slice %30 {offsets = [0, 0], sizes = [16, 8], strides = [1, 1]} : vector<16x24xf32> to vector<16x8xf32>
      %34 = vector.extract_strided_slice %30 {offsets = [0, 8], sizes = [16, 8], strides = [1, 1]} : vector<16x24xf32> to vector<16x8xf32>
      %35 = vector.extract_strided_slice %30 {offsets = [0, 16], sizes = [16, 8], strides = [1, 1]} : vector<16x24xf32> to vector<16x8xf32>
      %36 = arith.mulf %34, %arg16 : vector<16x8xf32>
      %37 = arith.mulf %33, %32 : vector<16x8xf32>
      %38 = arith.addf %36, %37 : vector<16x8xf32>
      %39 = math.tanh %38 : vector<16x8xf32>
      %40 = arith.mulf %35, %39 : vector<16x8xf32>
      %cst_24 = arith.constant dense<0.000000e+00> : vector<16x32xf32>
      %41 = tpu.matmul %40, %7, %cst_24 {dimension_numbers = #tpu.dot_dimension_numbers<[1], [0], [0], [1], [0, 0, 1, 1], [], []>} : vector<16x8xf32>, vector<8x32xf32>, vector<16x32xf32> -> vector<16x32xf32>
      %42 = vector.broadcast %8 : vector<1x32xf32> to vector<16x32xf32>
      %43 = arith.addf %41, %42 : vector<16x32xf32>
      %cst_25 = arith.constant dense<0.000000e+00> : vector<16x32xf32>
      %44 = tpu.matmul %43, %9, %cst_25 {dimension_numbers = #tpu.dot_dimension_numbers<[1], [0], [0], [1], [0, 0, 1, 1], [], []>} : vector<16x32xf32>, vector<32x32xf32>, vector<16x32xf32> -> vector<16x32xf32>
      %cst_26 = arith.constant 0.176776692 : f32
      %45 = vector.broadcast %cst_26 : f32 to vector<16x32xf32>
      %46 = arith.mulf %44, %45 : vector<16x32xf32>
      %47 = math.tanh %46 : vector<16x32xf32>
      %48 = arith.index_cast %arg14 : i32 to index
      %c0_27 = arith.constant 0 : index
      %49 = vector.load %arg2[%48, %c0_27] : memref<8x16xf32, #tpu.memory_space<vmem>>, vector<1x16xf32>
      %cst_28 = arith.constant dense<0.000000e+00> : vector<1x32xf32>
      %50 = tpu.matmul %49, %47, %cst_28 {dimension_numbers = #tpu.dot_dimension_numbers<[1], [0], [0], [1], [0, 0, 1, 1], [], []>} : vector<1x16xf32>, vector<16x32xf32>, vector<1x32xf32> -> vector<1x32xf32>
      %51 = math.tanh %50 : vector<1x32xf32>
      %52 = arith.index_cast %arg14 : i32 to index
      %c0_29 = arith.constant 0 : index
      %53 = vector.load %arg9[%52, %c0_29] : memref<8x32xf32, #tpu.memory_space<vmem>>, vector<1x32xf32>
      tpu.vector_store %arg9[%52, %c0_29], %51 {strides = array<i32>} : memref<8x32xf32, #tpu.memory_space<vmem>>, vector<1x32xf32>,
      scf.yield %40, %38 : vector<16x8xf32>, vector<16x8xf32>
    }
    %c0_15 = arith.constant 0 : index
    %c0_16 = arith.constant 0 : index
    %15 = vector.load %arg12[%c0_15, %c0_16] : memref<16x8xf32, #tpu.memory_space<vmem>>, vector<16x8xf32>
    tpu.vector_store %arg12[%c0_15, %c0_16], %14#0 {strides = array<i32>} : memref<16x8xf32, #tpu.memory_space<vmem>>, vector<16x8xf32>,
    %c0_17 = arith.constant 0 : index
    %c0_18 = arith.constant 0 : index
    %16 = vector.load %arg13[%c0_17, %c0_18] : memref<16x8xf32, #tpu.memory_space<vmem>>, vector<16x8xf32>
    tpu.vector_store %arg13[%c0_17, %c0_18], %14#1 {strides = array<i32>} : memref<16x8xf32, #tpu.memory_space<vmem>>, vector<16x8xf32>,
    %c0_i32_19 = arith.constant 0 : i32
    %17 = arith.cmpi eq, %arg0, %c0_i32_19 : i32
    %18 = arith.extui %17 : i1 to i32
    %c0_i32_20 = arith.constant 0 : i32
    %19 = arith.cmpi ne, %18, %c0_i32_20 : i32
    scf.if %19 {
      %c0_21 = arith.constant 0 : index
      %c0_22 = arith.constant 0 : index
      %20 = vector.load %arg10[%c0_21, %c0_22] : memref<16x8xf32, #tpu.memory_space<vmem>>, vector<16x8xf32>
      tpu.vector_store %arg10[%c0_21, %c0_22], %14#0 {strides = array<i32>} : memref<16x8xf32, #tpu.memory_space<vmem>>, vector<16x8xf32>,
      %c0_23 = arith.constant 0 : index
      %c0_24 = arith.constant 0 : index
      %21 = vector.load %arg11[%c0_23, %c0_24] : memref<16x8xf32, #tpu.memory_space<vmem>>, vector<16x8xf32>
      tpu.vector_store %arg11[%c0_23, %c0_24], %14#1 {strides = array<i32>} : memref<16x8xf32, #tpu.memory_space<vmem>>, vector<16x8xf32>,
    } else {
    }
    return
  }
  func.func @transform_0(%arg0: i32) -> (i32, i32, i32) {
    %c0_i32 = arith.constant 0 : i32
    %c0_i32_0 = arith.constant 0 : i32
    %c0_i32_1 = arith.constant 0 : i32
    return %arg0, %c0_i32, %c0_i32_0 : i32, i32, i32
  }
  func.func @transform_1(%arg0: i32) -> (i32, i32) {
    %c0_i32 = arith.constant 0 : i32
    %c0_i32_0 = arith.constant 0 : i32
    return %arg0, %c0_i32 : i32, i32
  }
  func.func @transform_2(%arg0: i32) -> (i32, i32) {
    %c0_i32 = arith.constant 0 : i32
    %c0_i32_0 = arith.constant 0 : i32
    %c0_i32_1 = arith.constant 0 : i32
    return %c0_i32, %c0_i32_0 : i32, i32
  }
  func.func @transform_3(%arg0: i32) -> (i32, i32) {
    %c0_i32 = arith.constant 0 : i32
    %c0_i32_0 = arith.constant 0 : i32
    %c0_i32_1 = arith.constant 0 : i32
    return %c0_i32, %c0_i32_0 : i32, i32
  }
  func.func @transform_4(%arg0: i32) -> (i32, i32) {
    %c0_i32 = arith.constant 0 : i32
    %c0_i32_0 = arith.constant 0 : i32
    %c0_i32_1 = arith.constant 0 : i32
    return %c0_i32, %c0_i32_0 : i32, i32
  }
  func.func @transform_5(%arg0: i32) -> (i32, i32) {
    %c0_i32 = arith.constant 0 : i32
    %c0_i32_0 = arith.constant 0 : i32
    %c0_i32_1 = arith.constant 0 : i32
    return %c0_i32, %c0_i32_0 : i32, i32
  }
  func.func @transform_6(%arg0: i32) -> (i32, i32) {
    %c0_i32 = arith.constant 0 : i32
    %c0_i32_0 = arith.constant 0 : i32
    %c0_i32_1 = arith.constant 0 : i32
    return %c0_i32, %c0_i32_0 : i32, i32
  }
  func.func @transform_7(%arg0: i32) -> (i32, i32) {
    %c0_i32 = arith.constant 0 : i32
    %c0_i32_0 = arith.constant 0 : i32
    %c0_i32_1 = arith.constant 0 : i32
    return %c0_i32, %c0_i32_0 : i32, i32
  }
  func.func @transform_8(%arg0: i32) -> (i32, i32) {
    %c0_i32 = arith.constant 0 : i32
    %c0_i32_0 = arith.constant 0 : i32
    return %arg0, %c0_i32 : i32, i32
  }
  func.func @transform_9(%arg0: i32) -> (i32, i32) {
    %c0_i32 = arith.constant 0 : i32
    %c0_i32_0 = arith.constant 0 : i32
    %c0_i32_1 = arith.constant 0 : i32
    return %c0_i32, %c0_i32_0 : i32, i32
  }
  func.func @transform_10(%arg0: i32) -> (i32, i32) {
    %c0_i32 = arith.constant 0 : i32
    %c0_i32_0 = arith.constant 0 : i32
    %c0_i32_1 = arith.constant 0 : i32
    return %c0_i32, %c0_i32_0 : i32, i32
  }
}

</mosaic_0001>

<bundles_post_ra>
// kernel: tpu_custom_call.1
= control target key start
LH: loop header
LB: loop body
LE: loop exit
PB: predicated region body
PF: predicated region fallthrough
CT: control target
= control target key end

     0   :  { %16 = vsyncpa [#allocation5], 0  ;;  %s993_s0 = inlined_call_operand.hbm [shape: f32[8,16,32], index: 0, kind: input, shape index: {}]   ;;  %s994_s1 = inlined_call_operand.vmem [shape: f32[8,16], index: 1, kind: input, shape index: {}]   ;;  %s995_s2 = inlined_call_operand.vmem [shape: f32[16,8], index: 2, kind: input, shape index: {}]   ;;  %s996_s3 = inlined_call_operand.vmem [shape: f32[16,8], index: 3, kind: input, shape index: {}]   ;;  %s997_s4 = inlined_call_operand.vmem [shape: f32[8,32], index: 4, kind: input, shape index: {}]   ;;  %s998_s5 = inlined_call_operand.vmem [shape: f32[8,32], index: 5, kind: input, shape index: {}]   ;;  %s999_s6 = inlined_call_operand.vmem [shape: f32[1,32], index: 6, kind: input, shape index: {}]   ;;  %s1000_s7 = inlined_call_operand.vmem [shape: f32[32,32], index: 7, kind: input, shape index: {}]   ;;  %s1001_s8 = inlined_call_operand.hbm [shape: f32[8,32], index: 8, kind: output, shape index: {0}]   ;;  %s1002_s9 = inlined_call_operand.vmem [shape: f32[16,8], index: 9, kind: output, shape index: {1}]   ;;  %s1003_s10 = inlined_call_operand.vmem [shape: f32[16,8], index: 10, kind: output, shape index: {2}]  }
   0x1   :  { %17 = vsyncpa [#allocation6], 0  ;;  %s778_s13 = smov [#allocation4]   ;;  %s690_s17 = scalar_lea.hbm %s993_s0, 2048 }
   0x2   :  { %s23_s14 = sshll.u32 %s778_s13, 4  ;;  %p691_p0 = scmp.ne.s32.totalorder %s993_s0, %s690_s17  ;;  %s24_s14 = int_to_ptr.vmem [resolvable:$true] %s23_s14 }
   0x3   :  { %p694_p1 = scmp.lt.u32.totalorder %s690_s17, %s993_s0 }
   0x5   :  { %p696_p2 = pnand %p694_p1, %p691_p0 }
   0x7   :  { %699 = shalt.err (!%p696_p2)
}
   0x8   :  { %s700_s22 = scalar_lea.vmem %s24_s14, 2048  ;;  %p705_p4 = scmp.lt.s32.totalorder %s24_s14, %s24_s14 }
   0x9   :  { %p701_p3 = scmp.ne.s32.totalorder %s24_s14, %s700_s22  ;;  %p706_p5 = scmp.lt.s32.totalorder %s700_s22, %s700_s22 }
   0xb   :  { %p707_p6 = por %p706_p5, %p705_p4 }
   0xd   :  { %p708_p7 = pnand %p707_p6, %p701_p3 }
   0xf   :  { %711 = shalt.err (!%p708_p7)
}
  0x10   :  { %s779_s23 = smov 128   ;;  %s780_s24 = smov 8  }
  0x11   :  { %29 = dma.hbm_to_vmem [thread:$0]  %s993_s0, 2048, %s24_s14, [#allocation5], %s779_s23, %s779_s23, %s780_s24  }
  0x12   :  { %754 = dma.done.wait [#allocation5], 2048  }
  0x13   :  { %755 = vsyncadd [#allocation5], 4294965248  ;;  %v859_v0 = vld [vmem:[%s997_s4] sm:$0xff]  ;;  %vm53_vm0 = vcmask 64512   ;;  %v879_v4 = vld [vmem:[%s1000_s7 + $0x8] sm:$0xff] }
  0x14   :  { %v864_v1 = vld [vmem:[%s998_s5] sm:$0xff]  ;;  %v884_v5 = vld [vmem:[%s1000_s7 + $0x10] sm:$0xff]  ;;  %v889_v6 = vld [vmem:[%s1000_s7 + $0x18] sm:$0xff] }
  0x15   :  { %v869_v2 = vld [vmem:[%s999_s6] ss:$0 sm:$0xff]  ;;  %v52_v8 = vld [vmem:[%s995_s2 + $0x8] sm:$0xff] }
  0x16   :  { %v874_v3 = vld [vmem:[%s1000_s7] sm:$0xff]  ;;  %55 = vst.msk [vmem:[#allocation2 + $0x8] sm:$0xff] %vm53_vm0, %v52_v8  ;;  %v57_v10 = vld [vmem:[%s996_s3 + $0x8] sm:$0xff] }
  0x17   :  { %v51_v7 = vld [vmem:[%s995_s2] sm:$0xff]  ;;  %59 = vst.msk [vmem:[#allocation3 + $0x8] sm:$0xff] %vm53_vm0, %v57_v10  ;;  %s915_s2 = smov 0  }
  0x18   :  { %54 = vst.msk [vmem:[#allocation2] sm:$0xff] %vm53_vm0, %v51_v7  ;;  %v56_v9 = vld [vmem:[%s996_s3] sm:$0xff] }
  0x19   :  { %58 = vst.msk [vmem:[#allocation3] sm:$0xff] %vm53_vm0, %v56_v9 }
  0x1d   :  { %v72_v12 = vld [vmem:[#allocation2 + $0x8] sm:$0xff]  }
  0x1e   :  { %v74_v14 = vld [vmem:[#allocation3 + $0x8] sm:$0xff]  }
  0x1f   :  { %v71_v11 = vld [vmem:[#allocation2] sm:$0xff]  }
  0x20   :  { %v73_v13 = vld [vmem:[#allocation3] sm:$0xff]  }
  0x21 LB: > { %578 = vmatprep.subr.mxu0 %v859_v0  ;;  %583 = vmatprep.subr.mxu1 %v864_v1  ;;  %s781_s3 = smov 8   ;;  %s552_s7 = sshll.u32 %s776_s2, 4  ;;  %v606_v45 = vpack.c.bf16 %v879_v4, %v874_v3  ;;  %v610_v54 = vpack.c.bf16 %v889_v6, %v884_v5  ;;  %vm320_vm1 = vcmask 261120   ;;  %v785_v59 = vmov 0.0|0.0   ;;  %s776_s2 = sphi %s915_s2, %s78_s2   ;;  %v772_v11 = vphi %v71_v11, %v1007_v11   ;;  %v768_v12 = vphi %v72_v12, %v1006_v12   ;;  %v764_v13 = vphi %v73_v13, %v1005_v13   ;;  %v760_v14 = vphi %v74_v14, %v1004_v14  }
  0x22   : > { %579 = vmatpush3.msra.mxu0 %v859_v0  ;;  %584 = vmatpush3.msra.mxu1 %v864_v1  ;;  %s86_s25 = scalar_lea.vmem [#allocation4], %s552_s7  ;;  %s782_s26 = smov 104   ;;  %vm786_vm2 = vmmov 0   ;;  %v787_v60 = vmov 0.0   ;;  %vm408_vm3 = vcmask 130048   ;;  %vm484_vm4 = vcmask 253952  }
  0x23   : > { %580 = vmatprep.mubr.msk.f32.mxu0 %vm53_vm0, %v772_v11  ;;  %189 = vrot.lane.b32.xlu1 %v764_v13, %s781_s3  ;;  %v87_v15 = vld [vmem:[%s86_s25] sm:$0xff]  ;;  %v88_v17 = vld [vmem:[%s86_s25 + $0x8] sm:$0xff]  ;;  %s783_s27 = smov 112   ;;  %s784_s28 = smov 120  }
  0x24   : > { %581 = vmatmul.mubr.msk.f32.vlgmr.msra.gmra.mrb[0].mxu0 %vm53_vm0, %v768_v12  ;;  %607 = vmatprep.subr.bf16.mxu0 %v606_v45  ;;  %s406_s11 = scalar_lea.vmem %s994_s1, %s776_s2  ;;  %s483_s12 = scalar_lea.vmem [#allocation7], %s776_s2 }
  0x25   : > { %609 = vmatpush3.bf16.msra.mxu0 %v606_v45  ;;  %614 = vmatprep.subr.bf16.mxu1 %v785_v59  ;;  %v407_v11 = vld [vmem:[%s406_s11] sm:$0x1]  ;;  %s78_s2 = sadd.s32 1, %s776_s2  }
  0x26   : > { %611 = vmatprep.subr.bf16.mxu0 %v610_v54  ;;  %p77_p8 = scmp.ge.s32.totalorder %s78_s2, 8 }
  0x27   : > { %191 = vrot.lane.b32.xlu1 %v760_v14, %s781_s3  ;;  %s788_s17 = smov (%p77_p8), [#allocation7]  }
  0x28   :  { %s514_s6 = sshll.u32 (%p77_p8), %s788_s17, 4  ;;  %s515_s6 = int_to_ptr.vmem [resolvable:$true] %s514_s6 }
  0x29   : > { %613 = vmatpush3.bf16.msra.mxu0 %v610_v54  ;;  %s712_s18 = scalar_lea.vmem (%p77_p8), %s515_s6, 128  ;;  %p717_p10 = scmp.lt.s32.totalorder (%p77_p8), %s515_s6, %s515_s6 }
  0x2a   :  { %p713_p9 = scmp.ne.s32.totalorder (%p77_p8), %s515_s6, %s712_s18  ;;  %p718_p11 = scmp.lt.s32.totalorder (%p77_p8), %s712_s18, %s712_s18 }
  0x2c   :  { %p719_p12 = por (%p77_p8), %p718_p11, %p717_p10 }
  0x2e   :  { %p720_p13 = pnand (%p77_p8), %p719_p12, %p713_p9 }
  0x95   : > { %v190_v35 = vpop.permute.xlu1 %189 }
  0x99   : > { %v192_v37 = vpop.permute.xlu1 %191 }
  0xf7   : > { %v582_v16 = vpop.f32.mrb[0].mxu0 }
  0xf8   : > { %v162_v18 = vpop.f32.mrb[1].mxu0  ;;  %v172_v20 = vadd.f32 %v582_v16, %v88_v17 }
  0xf9   : > { %v171_v19 = vadd.f32 %v162_v18, %v87_v15 }
  0xfa   : > { %v556_v24 = vmul.f32 -1.442695, %v172_v20 }
  0xfb   : > { %668 = vtanh.f32 %v171_v19  ;;  %v555_v23 = vmul.f32 -1.442695, %v171_v19 }
  0xfc   : > { %670 = vtanh.f32 %v172_v20 }
  0xfd   : > { %672 = vpow2.f32 %v555_v23 }
  0xfe   : > { %674 = vpow2.f32 %v556_v24 }
 0x105   : > { %v669_v21 = vpop.eup %668 }
 0x106   : > { %199 = vrot.lane.b32.xlu0 %v669_v21, %s782_s26  ;;  %v671_v22 = vpop.eup %670 }
 0x107   : > { %v673_v25 = vpop.eup %672 }
 0x108   : > { %v179_v26 = vadd.f32 1.0, %v673_v25  ;;  %v675_v27 = vpop.eup %674 }
 0x109   : > { %v180_v28 = vadd.f32 1.0, %v675_v27 }
 0x10a   : > { %201 = vrot.lane.b32.xlu0 %v671_v22, %s782_s26  ;;  %676 = vrcp.f32 %v179_v26 }
 0x10b   : > { %678 = vrcp.f32 %v180_v28 }
 0x114   : > { %v677_v29 = vpop.eup %676 }
 0x115   : > { %v679_v32 = vpop.eup %678  ;;  %v195_v36 = vmul.f32 %v677_v29, %v190_v35 }
 0x116   : > { %v196_v40 = vmul.f32 %v679_v32, %v192_v37 }
 0x178   : > { %v200_v30 = vpop.permute.xlu0 %199 }
 0x179   : > { %v205_v31 = vmul.f32 %v677_v29, %v200_v30 }
 0x17b   : > { %209 = vrot.lane.b32.xlu0 %v205_v31, %s781_s3 }
 0x17c   : > { %v202_v33 = vpop.permute.xlu0 %201 }
 0x17d   : > { %v206_v34 = vmul.f32 %v679_v32, %v202_v33 }
 0x17f   : > { %211 = vrot.lane.b32.xlu1 %v206_v34, %s781_s3 }
 0x1ed   : > { %v210_v38 = vpop.permute.xlu0 %209 }
 0x1ee   : > { %v215_v39 = vadd.f32 %v210_v38, %v195_v36 }
 0x1f0   : > { %680 = vtanh.f32 %v215_v39 }
 0x1f1   : > { %v212_v41 = vpop.permute.xlu1 %211 }
 0x1f2   : > { %v216_v42 = vadd.f32 %v212_v41, %v196_v40 }
 0x1f4   : > { %682 = vtanh.f32 %v216_v42 }
 0x1fa   : > { %v681_v43 = vpop.eup %680 }
 0x1fb   : > { %221 = vrot.lane.b32.xlu0 %v681_v43, %s781_s3 }
 0x1fe   : > { %v683_v44 = vpop.eup %682 }
 0x1ff   : > { %223 = vrot.lane.b32.xlu1 %v683_v44, %s781_s3 }
 0x26d   : > { %v222_v46 = vpop.permute.xlu0 %221 }
 0x26e   : > { %v227_v47 = vmul.f32 %v677_v29, %v222_v46 }
 0x270   : > { %237 = vrot.lane.b32.xlu0 %v227_v47, %s783_s27 }
 0x271   : > { %v224_v48 = vpop.permute.xlu1 %223 }
 0x272   : > { %v228_v49 = vmul.f32 %v679_v32, %v224_v48 }
 0x274   : > { %490 = vrot.lane.b32.xlu0 %v215_v39, %s784_s28  ;;  %239 = vrot.lane.b32.xlu1 %v228_v49, %s783_s27 }
 0x278   : > { %492 = vrot.lane.b32.xlu1 %v216_v42, %s784_s28 }
 0x2e2   : > { %v238_v50 = vpop.permute.xlu0 %237  }
 0x2e3   : > { %585 = vmatprep.mubr.msk.f32.mxu1 %vm53_vm0, %v238_v50  ;;  %497 = vst.msk [vmem:[#allocation2] sm:$0xff] (%p77_p8), %vm53_vm0, %v238_v50  ;;  %504 = vst.msk [vmem:[%s1002_s9] sm:$0xff] (%p77_p8), %vm53_vm0, %v238_v50 }
 0x2e6   : > { %v491_v51 = vpop.permute.xlu0 %490   ;;  %v240_v52 = vpop.permute.xlu1 %239  }
 0x2e7   : > { %586 = vmatmul.mubr.msk.f32.vlgmr.msra.gmra.mrb[0].mxu1 %vm53_vm0, %v240_v52  ;;  %498 = vst.msk [vmem:[#allocation2 + $0x8] sm:$0xff] (%p77_p8), %vm53_vm0, %v240_v52  ;;  %499 = vst.msk [vmem:[#allocation3] sm:$0xff] (%p77_p8), %vm53_vm0, %v491_v51 }
 0x2e8   : > { %603 = vmatprep.mubr.msk.f32.mxu1 %vm786_vm2, %v787_v60  ;;  %505 = vst.msk [vmem:[%s1002_s9 + $0x8] sm:$0xff] (%p77_p8), %vm53_vm0, %v240_v52  ;;  %506 = vst.msk [vmem:[%s1003_s10] sm:$0xff] (%p77_p8), %vm53_vm0, %v491_v51 }
 0x2ea   : > { %v493_v53 = vpop.permute.xlu1 %492  }
 0x2eb   :  { %500 = vst.msk [vmem:[#allocation3 + $0x8] sm:$0xff] (%p77_p8), %vm53_vm0, %v493_v53  ;;  %507 = vst.msk [vmem:[%s1003_s10 + $0x8] sm:$0xff] (%p77_p8), %vm53_vm0, %v493_v53 }
 0x3ba   : > { %v587_v55 = vpop.f32.mrb[0].mxu1 }
 0x3bb   : > { %v311_v56 = vpop.f32.mrb[1].mxu1  ;;  %v317_v58 = vadd.f32 %v587_v55, %v869_v2 }
 0x3bc   : > { %v312_v57 = vadd.f32 %v869_v2, %v311_v56 }
 0x3be   : > { %596 = vmatprep.mubr.msk.f32.mxu0 %vm320_vm1, %v312_v57 }
 0x3bf   : > { %597 = vmatmul.mubr.msk.f32.vlgmr.msra.gmra.mrb[2].mxu0 %vm320_vm1, %v317_v58 }
 0x492   : > { %v598_v61 = vpop.f32.mrb[2].mxu0 }
 0x493   : > { %v403_v62 = vmul.f32 0.17677669, %v598_v61  ;;  %v393_v63 = vpop.f32.mrb[3].mxu0 }
 0x494   : > { %v402_v7 = vmul.f32 0.17677669, %v393_v63 }
 0x495   : > { %684 = vtanh.f32 %v403_v62 }
 0x496   : > { %686 = vtanh.f32 %v402_v7 }
 0x49f   : > { %v685_v8 = vpop.eup %684 }
 0x4a0   : > { %v687_v9 = vpop.eup %686 }
 0x4a1   : > { %v615_v10 = vpack.c.bf16 %v685_v8, %v687_v9 }
 0x4a3   : > { %616 = vmatpush3.bf16.msra.mxu1 %v615_v10 }
 0x4a6   : > { %604 = vmatmul.mubr.msk.f32.vlgmr.msra.gmra.mrb[2].mxu1 %vm408_vm3, %v407_v11  ;;  %v1007_v11 = vmov %v238_v50 }
 0x579   : > { %v478_v12 = vpop.f32.mrb[2].mxu1 }
 0x57a   : > { %688 = vtanh.f32 %v478_v12  ;;  %v605_v13 = vpop.f32.mrb[3].mxu1  ;;  %v1006_v12 = vmov %v240_v52 }
 0x57b   : > { %v1005_v13 = vmov %v491_v51 }
 0x57f   :  { %80 = sbr.rel (!%p77_p8) target bundleno = 33 (0x21), region = 90 }
 0x584   : > { %v689_v14 = vpop.eup %688 }
 0x585   : > { %485 = vst.msk [vmem:[%s483_s12] sm:$0x1] %vm484_vm4, %v689_v14  ;;  %v1004_v14 = vmov %v493_v53 }
 0x586   :  { %723 = shalt.err (!%p720_p13)
}
 0x587   :  { %s724_s20 = scalar_lea.hbm %s1001_s8, 128 }
 0x588   :  { %p725_p0 = scmp.ne.s32.totalorder %s1001_s8, %s724_s20  ;;  %p728_p1 = scmp.lt.u32.totalorder %s724_s20, %s1001_s8 }
 0x58a   :  { %p730_p2 = pnand %p728_p1, %p725_p0 }
 0x58c   :  { %733 = shalt.err (!%p730_p2)
}
 0x58d   :  { %517 = dma.vmem_to_hbm [thread:$0]  %s515_s6, 128, %s1001_s8, [#allocation6]  }
 0x58e   :  { %756 = dma.done.wait [#allocation6], 128  }
 0x58f   :  { %757 = vsyncadd [#allocation6], 4294967168 }
 0x590   :  { %529 = vsyncpa [#allocation5], 1 }
 0x591   :  { %530 = vsyncpa [#allocation6], 1 }

</bundles_post_ra>
